<compile_context>
chip_gen: v7x
topology: tpu7x:2x2x1
jax: 0.10.0
libtpu: 0.0.40
codegen_flags: <defaults>
</compile_context>

<pallas_src>
import functools

import jax
import jax.numpy as jnp
from jax.experimental import pallas as pl
from jax.experimental.pallas import tpu as pltpu


def _se_kernel(x_ref, w1_ref, b1_ref, w2t_ref, b2_ref, o_ref, *, inv_hw):
    # x_ref : (TB, C, HWp)  batch tile; channels on sublanes, spatial on lanes
    # w1    : (mid, C)   b1: (1, mid)
    # w2t   : (mid, C)   b2: (1, C)
    x = x_ref[...].astype(jnp.float32)                          # (TB, C, HWp)

    # --- squeeze: global average pool (zero padding -> sum * 1/true_HW) ---
    pooled = jnp.sum(x, axis=-1) * inv_hw                       # (TB, C)

    # --- excitation on VPU/XLU (mid is tiny; MXU would be ~all padding) ---
    w1 = w1_ref[...].astype(jnp.float32)                        # (mid, C)
    h = jnp.sum(pooled[:, None, :] * w1[None, :, :], axis=-1)   # (TB, mid)
    h = jnp.maximum(h + b1_ref[...].astype(jnp.float32), 0.0)   # FC1 + ReLU

    w2t = w2t_ref[...].astype(jnp.float32)                      # (mid, C)
    s = jnp.sum(h[:, :, None] * w2t[None, :, :], axis=1)        # (TB, C)
    s = jax.nn.sigmoid(s + b2_ref[...].astype(jnp.float32))     # FC2 + sigmoid

    # --- scale: per-channel gate broadcast over the spatial lanes ---
    o_ref[...] = (x * s[:, :, None]).astype(o_ref.dtype)


def se_layer(x, w1, b1, w2, b2):
    """x: (B, C, H, W); w1: (mid, C); b1: (mid,); w2: (C, mid); b2: (C,)."""
    B, C, H, W = x.shape
    mid = w1.shape[0]
    HW = H * W

    # Lane-dense spatial axis: pad flattened HW up to a multiple of 128.
    HWp = ((HW + 127) // 128) * 128
    # At most 2 grid steps (batch halves) so both v7x TensorCores get work.
    nsteps = 2 if B >= 2 else 1
    TB = -(-B // nsteps)
    Bp = nsteps * TB

    x_flat = x.reshape(B, C, HW)
    if (Bp, HWp) != (B, HW):
        x_flat = jnp.pad(x_flat, ((0, Bp - B), (0, 0), (0, HWp - HW)))

    w2t = w2.T                       # (mid, C): keep lanes C-dense in kernel
    b1_2d = b1.reshape(1, mid)
    b2_2d = b2.reshape(1, C)

    kernel = functools.partial(_se_kernel, inv_hw=1.0 / float(HW))

    out_flat = pl.pallas_call(
        kernel,
        out_shape=jax.ShapeDtypeStruct((Bp, C, HWp), x.dtype),
        grid_spec=pltpu.PrefetchScalarGridSpec(
            num_scalar_prefetch=0,
            grid=(nsteps,),
            in_specs=[
                pl.BlockSpec((TB, C, HWp), lambda i: (i, 0, 0)),
                # Constant index maps: these tiny params are fetched once.
                pl.BlockSpec((mid, C), lambda i: (0, 0)),
                pl.BlockSpec((1, mid), lambda i: (0, 0)),
                pl.BlockSpec((mid, C), lambda i: (0, 0)),
                pl.BlockSpec((1, C), lambda i: (0, 0)),
            ],
            out_specs=pl.BlockSpec((TB, C, HWp), lambda i: (i, 0, 0)),
        ),
        compiler_params=pltpu.CompilerParams(
            dimension_semantics=("parallel",)),
        input_output_aliases={0: 0},
    )(x_flat, w1, b1_2d, w2t, b2_2d)

    return out_flat[:B, :, :HW].reshape(B, C, H, W)


def se_layer_ref(x, w1, b1, w2, b2):
    """Pure-JAX reference mirroring the PyTorch SELayer forward."""
    y = jnp.mean(x, axis=(2, 3))                     # (B, C)
    y = jnp.maximum(y @ w1.T + b1, 0.0)              # (B, mid)
    y = jax.nn.sigmoid(y @ w2.T + b2)                # (B, C)
    return x * y[:, :, None, None]


if __name__ == "__main__":
    # Module config used by PIXOR's backbone: SELayer(32), reduction=16 -> mid=2
    B, C, H, W = 2, 32, 16, 16
    reduction = 16
    mid = C // reduction

    key = jax.random.PRNGKey(0)
    kx, k1, k2, k3, k4 = jax.random.split(key, 5)

    x = jax.random.normal(kx, (B, C, H, W), dtype=jnp.float32)
    # nn.Linear shapes: weight=(out, in), bias=(out,)
    w1 = jax.random.normal(k1, (mid, C), dtype=jnp.float32) * 0.1
    b1 = jax.random.normal(k2, (mid,), dtype=jnp.float32) * 0.1
    w2 = jax.random.normal(k3, (C, mid), dtype=jnp.float32) * 0.1
    b2 = jax.random.normal(k4, (C,), dtype=jnp.float32) * 0.1

    out = se_layer(x, w1, b1, w2, b2)
    jax.block_until_ready(out)

    ref = se_layer_ref(x, w1, b1, w2, b2)
    assert out.shape == (B, C, H, W)
    assert jnp.allclose(out, ref, atol=1e-5, rtol=1e-5), "mismatch vs reference"

    print("KERNEL_OK")
</pallas_src>

<mosaic_0001>
module attributes {stable_mosaic.version = 11 : i64} {
  func.func @_se_kernel(%arg0: i32, %arg1: memref<1x32x256xf32, #tpu.memory_space<vmem>>, %arg2: memref<2x32xf32, #tpu.memory_space<vmem>>, %arg3: memref<1x2xf32, #tpu.memory_space<vmem>>, %arg4: memref<2x32xf32, #tpu.memory_space<vmem>>, %arg5: memref<1x32xf32, #tpu.memory_space<vmem>>, %arg6: memref<1x32x256xf32, #tpu.memory_space<vmem>>) attributes {dimension_semantics = [#tpu.dimension_semantics<parallel>], iteration_bounds = array<i64: 2>, scalar_prefetch = 0 : i64, scratch_operands = 0 : i64, tpu.core_type = #tpu.core_type<tc>, window_params = [{transform_indices = @transform_0, window_bounds = array<i64: 1, 32, 256>}, {pipeline_mode = #tpu.pipeline_mode<synchronous>, transform_indices = @transform_1, window_bounds = array<i64: 2, 32>}, {pipeline_mode = #tpu.pipeline_mode<synchronous>, transform_indices = @transform_2, window_bounds = array<i64: 1, 2>}, {pipeline_mode = #tpu.pipeline_mode<synchronous>, transform_indices = @transform_3, window_bounds = array<i64: 2, 32>}, {pipeline_mode = #tpu.pipeline_mode<synchronous>, transform_indices = @transform_4, window_bounds = array<i64: 1, 32>}, {transform_indices = @transform_5, window_bounds = array<i64: 1, 32, 256>}]} {
    %c0 = arith.constant 0 : index
    %c0_0 = arith.constant 0 : index
    %c0_1 = arith.constant 0 : index
    %0 = vector.load %arg1[%c0, %c0_0, %c0_1] : memref<1x32x256xf32, #tpu.memory_space<vmem>>, vector<1x32x256xf32>
    %cst = arith.constant dense<0.000000e+00> : vector<1x32xf32>
    %1 = vector.multi_reduction <add>, %0, %cst [2] : vector<1x32x256xf32> to vector<1x32xf32>
    %cst_2 = arith.constant 3.906250e-03 : f32
    %2 = vector.broadcast %cst_2 : f32 to vector<1x32xf32>
    %3 = arith.mulf %1, %2 : vector<1x32xf32>
    %c0_3 = arith.constant 0 : index
    %c0_4 = arith.constant 0 : index
    %4 = vector.load %arg2[%c0_3, %c0_4] : memref<2x32xf32, #tpu.memory_space<vmem>>, vector<2x32xf32>
    %5 = vector.shape_cast %3 : vector<1x32xf32> to vector<1x1x32xf32>
    %6 = vector.shape_cast %4 : vector<2x32xf32> to vector<1x2x32xf32>
    %7 = vector.broadcast %5 : vector<1x1x32xf32> to vector<1x2x32xf32>
    %8 = arith.mulf %7, %6 : vector<1x2x32xf32>
    %cst_5 = arith.constant dense<0.000000e+00> : vector<1x2xf32>
    %9 = vector.multi_reduction <add>, %8, %cst_5 [2] : vector<1x2x32xf32> to vector<1x2xf32>
    %c0_6 = arith.constant 0 : index
    %c0_7 = arith.constant 0 : index
    %10 = vector.load %arg3[%c0_6, %c0_7] : memref<1x2xf32, #tpu.memory_space<vmem>>, vector<1x2xf32>
    %11 = arith.addf %9, %10 : vector<1x2xf32>
    %cst_8 = arith.constant 0.000000e+00 : f32
    %12 = vector.broadcast %cst_8 : f32 to vector<1x2xf32>
    %13 = arith.maximumf %11, %12 : vector<1x2xf32>
    %c0_9 = arith.constant 0 : index
    %c0_10 = arith.constant 0 : index
    %14 = vector.load %arg4[%c0_9, %c0_10] : memref<2x32xf32, #tpu.memory_space<vmem>>, vector<2x32xf32>
    %15 = vector.shape_cast %13 : vector<1x2xf32> to vector<1x2x1xf32>
    %16 = vector.shape_cast %14 : vector<2x32xf32> to vector<1x2x32xf32>
    %17 = vector.broadcast %15 : vector<1x2x1xf32> to vector<1x2x32xf32>
    %18 = arith.mulf %17, %16 : vector<1x2x32xf32>
    %cst_11 = arith.constant dense<0.000000e+00> : vector<1x32xf32>
    %19 = vector.multi_reduction <add>, %18, %cst_11 [1] : vector<1x2x32xf32> to vector<1x32xf32>
    %c0_12 = arith.constant 0 : index
    %c0_13 = arith.constant 0 : index
    %20 = vector.load %arg5[%c0_12, %c0_13] : memref<1x32xf32, #tpu.memory_space<vmem>>, vector<1x32xf32>
    %21 = arith.addf %19, %20 : vector<1x32xf32>
    %22 = arith.negf %21 : vector<1x32xf32>
    %23 = math.exp %22 : vector<1x32xf32>
    %cst_14 = arith.constant 1.000000e+00 : f32
    %24 = vector.broadcast %cst_14 : f32 to vector<1x32xf32>
    %25 = arith.addf %24, %23 : vector<1x32xf32>
    %26 = arith.divf %24, %25 : vector<1x32xf32>
    %27 = vector.shape_cast %26 : vector<1x32xf32> to vector<1x32x1xf32>
    %28 = vector.broadcast %27 : vector<1x32x1xf32> to vector<1x32x256xf32>
    %29 = arith.mulf %0, %28 : vector<1x32x256xf32>
    %c0_15 = arith.constant 0 : index
    %c0_16 = arith.constant 0 : index
    %c0_17 = arith.constant 0 : index
    %30 = vector.load %arg6[%c0_15, %c0_16, %c0_17] : memref<1x32x256xf32, #tpu.memory_space<vmem>>, vector<1x32x256xf32>
    tpu.vector_store %arg6[%c0_15, %c0_16, %c0_17], %29 {strides = array<i32>} : memref<1x32x256xf32, #tpu.memory_space<vmem>>, vector<1x32x256xf32>,
    return
  }
  func.func @transform_0(%arg0: i32) -> (i32, i32, i32) {
    %c0_i32 = arith.constant 0 : i32
    %c0_i32_0 = arith.constant 0 : i32
    %c0_i32_1 = arith.constant 0 : i32
    return %arg0, %c0_i32, %c0_i32_0 : i32, i32, i32
  }
  func.func @transform_1(%arg0: i32) -> (i32, i32) {
    %c0_i32 = arith.constant 0 : i32
    %c0_i32_0 = arith.constant 0 : i32
    %c0_i32_1 = arith.constant 0 : i32
    return %c0_i32, %c0_i32_0 : i32, i32
  }
  func.func @transform_2(%arg0: i32) -> (i32, i32) {
    %c0_i32 = arith.constant 0 : i32
    %c0_i32_0 = arith.constant 0 : i32
    %c0_i32_1 = arith.constant 0 : i32
    return %c0_i32, %c0_i32_0 : i32, i32
  }
  func.func @transform_3(%arg0: i32) -> (i32, i32) {
    %c0_i32 = arith.constant 0 : i32
    %c0_i32_0 = arith.constant 0 : i32
    %c0_i32_1 = arith.constant 0 : i32
    return %c0_i32, %c0_i32_0 : i32, i32
  }
  func.func @transform_4(%arg0: i32) -> (i32, i32) {
    %c0_i32 = arith.constant 0 : i32
    %c0_i32_0 = arith.constant 0 : i32
    %c0_i32_1 = arith.constant 0 : i32
    return %c0_i32, %c0_i32_0 : i32, i32
  }
  func.func @transform_5(%arg0: i32) -> (i32, i32, i32) {
    %c0_i32 = arith.constant 0 : i32
    %c0_i32_0 = arith.constant 0 : i32
    %c0_i32_1 = arith.constant 0 : i32
    return %arg0, %c0_i32, %c0_i32_0 : i32, i32, i32
  }
}

</mosaic_0001>

<bundles_post_ra>
// kernel: tpu_custom_call.1
= control target key start
LH: loop header
LB: loop body
LE: loop exit
PB: predicated region body
PF: predicated region fallthrough
CT: control target
= control target key end

     0   :  { %10 = vsyncpa [#allocation3], 0  ;;  %s996_s0 = inlined_call_operand.hbm [shape: f32[2,32,256], index: 0, kind: input, shape index: {}, may-alias: {0,5}]   ;;  %s997_s1 = inlined_call_operand.vmem [shape: f32[2,32], index: 1, kind: input, shape index: {}]   ;;  %s998_s2 = inlined_call_operand.vmem [shape: f32[1,2], index: 2, kind: input, shape index: {}]   ;;  %s999_s3 = inlined_call_operand.vmem [shape: f32[2,32], index: 3, kind: input, shape index: {}]   ;;  %s1000_s4 = inlined_call_operand.vmem [shape: f32[1,32], index: 4, kind: input, shape index: {}]   ;;  %s1001_s5 = inlined_call_operand.hbm [shape: f32[2,32,256], index: 5, kind: output, shape index: {}, may-alias: {0,5}]  }
   0x1   :  { %12 = vsyncpa [#allocation3 + $0x1], 0 }
   0x2   :  { %13 = vsyncpa [#allocation4], 0 }
   0x3   :  { %15 = vsyncpa [#allocation4 + $0x1], 0  ;;  %s774_s18 = smov 0   ;;  %s776_s19 = smov 0  }
   0x4   :  { %s778_s20 = smov 0   ;;  %s780_s21 = smov 0  }
   0x5 LB: > { %s795_s22 = sadd.s32 4294967295, %s735_s21   ;;  %s564_s23 = sadd.s32 4294967294, %s735_s21   ;;  %s735_s21 = sphi %s780_s21, %s1014_s21   ;;  %s731_s20 = sphi %s778_s20, %s1013_s20   ;;  %s727_s19 = sphi %s776_s19, %s1012_s19   ;;  %s723_s18 = sphi %s774_s18, %s1011_s18  }
   0x6   : > { %s799_s24 = sadd.s32 1, %s735_s21   ;;  %s28_s25 = sadd.s32 1, %s731_s20 }
   0x7   : > { %s25_s26 = ssub.s32 %s735_s21, %s799_s24  ;;  %p35_p0 = scmp.ne.s32.totalorder %s731_s20, %s727_s19 }
   0x8   : > { %p26_p1 = scmp.eq.s32.totalorder %s25_s26, 0  ;;  %p36_p2 = scmp.eq.s32.totalorder %s735_s21, 0 }
   0x9   : > { %p41_p3 = scmp.ne.s32.totalorder %s727_s19, %s723_s18  ;;  %p42_p4 = scmp.eq.s32.totalorder %s795_s22, 0 }
   0xa   : > { %s811_s27 = scalar_select %p26_p1, %s731_s20, %s28_s25  }
   0xb   : > { %p813_p5 = por %p36_p2, %p35_p0  ;;  %p817_p6 = por %p42_p4, %p41_p3 }
   0xc   : > { %p149_p7 = scmp.eq.s32.totalorder %s795_s22, 1  ;;  %p155_p8 = scmp.eq.s32.totalorder %s564_s23, 1 }
   0xd   : > { %p594_p10 = scmp.lt.s32.totalorder %s735_s21, 2  ;;  %s187_s7 = sand.u32 1, %s731_s20  }
   0xe   : > { %p824_p11 = por %p149_p7, %p35_p0  ;;  %p828_p12 = por %p155_p8, %p41_p3 }
   0xf   : > { %s580_s8 = sshll.u32 %s735_s21, 10  ;;  %s567_s9 = sshll.u32 %s187_s7, 6 }
  0x10   : > { %s1005_s30 = scalar_select %p824_p11, 1, 0 }
  0x11   : > { %s1006_s6 = scalar_select %p828_p12, 1, 0 }
  0x12   : > { %s837_s12 = scalar_lea.hbm %s996_s0, %s580_s8  ;;  %s191_s13 = scalar_lea.vmem [#allocation2], %s567_s9 }
  0x13   : > { %s198_s14 = sshll.u32 %s191_s13, 4  ;;  %p841_p13 = pnand %p594_p10, %p813_p5  ;;  %s845_s14 = int_to_ptr.vmem [resolvable:$true] %s198_s14 }
  0x14   : > { %s847_s16 = scalar_lea.sflag [#allocation3], %s187_s7  ;;  %s639_s17 = scalar_lea.hbm %s837_s12, 1024 }
  0x15   : > { %p640_p0 = scmp.ne.s32.totalorder %s837_s12, %s639_s17  ;;  %p641_p1 = pneg %p841_p13 }
  0x16   : > { %s644_s26 = scalar_lea.hbm %s996_s0, 2048  ;;  %p645_p4 = scmp.lt.u32.totalorder %s837_s12, %s996_s0 }
  0x17   : > { %p642_p2 = pnand %p641_p1, %p640_p0  ;;  %p646_p5 = scmp.lt.u32.totalorder %s644_s26, %s639_s17 }
  0x18   : > { %p648_p8 = scmp.lt.u32.totalorder %s639_s17, %s837_s12 }
  0x19   : > { %p643_p3 = pneg %p642_p2  ;;  %p647_p7 = por %p646_p5, %p645_p4 }
  0x1b   : > { %p649_p10 = por %p648_p8, %p647_p7 }
  0x1d   : > { %p650_p9 = pnand %p649_p10, %p643_p3 }
  0x1f   : > { %653 = shalt.err (!%p650_p9)
}
  0x20   : > { %s654_s7 = scalar_lea.vmem %s845_s14, 1024  ;;  %s737_s9 = smov [#allocation2]  }
  0x21   : > { %p655_p0 = scmp.ne.s32.totalorder %s845_s14, %s654_s7  ;;  %s659_s10 = sshll.u32 %s737_s9, 4  ;;  %s660_s10 = int_to_ptr.vmem [resolvable:$false] %s659_s10 }
  0x22   : > { %s661_s11 = scalar_lea.vmem %s660_s10, 2048  ;;  %p662_p11 = scmp.lt.s32.totalorder %s845_s14, %s660_s10 }
  0x23   : > { %p657_p2 = pnand %p655_p0, %p641_p1  ;;  %p663_p4 = scmp.lt.s32.totalorder %s661_s11, %s654_s7 }
  0x25   : > { %p658_p12 = pneg %p657_p2  ;;  %p664_p5 = por %p663_p4, %p662_p11 }
  0x27   : > { %p665_p7 = pnand %p664_p5, %p658_p12 }
  0x29   : > { %668 = shalt.err (!%p665_p7)
}
  0x2a   : > { %s738_s13 = smov 256   ;;  %s739_s17 = smov 16  }
  0x2b   : > { %589 = dma.hbm_to_vmem [thread:$0]  (!%p841_p13), %s837_s12, 1024, %s845_s14, %s847_s16, %s738_s13, %s738_s13, %s739_s17  }
  0x2c   : > { %p570_p9 = scmp.ge.s32.totalorder %s735_s21, 1  ;;  %p206_p1 = scmp.lt.s32.totalorder %s735_s21, 3 }
  0x2e   : > { %p207_p3 = pnand %p570_p9, %p206_p1 }
  0x2f   : > { %s878_s23 = sand.u32 (!%p207_p3), 1, %s727_s19  }
  0x30   : > { %210 = sbr.rel (%p207_p3) target bundleno = 823 (0x337), region = 40  ;;  %s571_s25 = sshll.u32 (!%p207_p3), %s878_s23, 6 }
  0x31   : > { %s213_s26 = scalar_lea.sflag (!%p207_p3), [#allocation3], %s878_s23  ;;  %s216_s28 = scalar_lea.vmem (!%p207_p3), [#allocation2], %s571_s25 }
  0x37   : > { %714 = dma.done.wait (%p817_p6), %s213_s26, 1024  }
  0x38   : > { %716 = vsyncadd (%p817_p6), %s213_s26, 4294966272  ;;  %v888_v0 = vld [vmem:[%s216_s28 + $0x20] sm:$0xff]  ;;  %v890_v1 = vld [vmem:[%s216_s28 + $0x28] sm:$0xff]  ;;  %v269_v12 = vlaneseq  ;;  %v740_v19 = vmov 0   ;;  %vm366_vm0 = vcmask 130112   ;;  %vm373_vm1 = vcmask 195712  }
  0x39   : > { %v892_v2 = vld [vmem:[%s216_s28] sm:$0xff]  ;;  %v257_v3 = vadd.f32 %v890_v1, %v888_v0  ;;  %v896_v4 = vld [vmem:[%s216_s28 + $0x8] sm:$0xff]  ;;  %v898_v5 = vld [vmem:[%s216_s28 + $0x30] sm:$0xff]  ;;  %634 = vset.pattern.permute.xlu1 %v740_v19  ;;  %633 = vset.pattern.permute.xlu0 %v740_v19  ;;  %vm380_vm2 = vcmask 261312   ;;  %vm401_vm3 = vcmask 1041409   ;;  %vm404_vm4 = vcmask 254976  }
  0x3a   : > { %v900_v6 = vld [vmem:[%s216_s28 + $0x38] sm:$0xff]  ;;  %v251_v7 = vadd.f32 %v896_v4, %v892_v2  ;;  %v904_v8 = vld [vmem:[%s216_s28 + $0x10] sm:$0xff]  ;;  %v912_v13 = vshrl.u32 %v269_v12, 7  ;;  %v267_v15 = vld [vmem:[%s997_s1] sm:$0x3]  ;;  %v356_v46 = vand.u32 127, %v269_v12 }
  0x3b   : > { %v906_v9 = vld [vmem:[%s216_s28 + $0x18] sm:$0xff]  ;;  %258 = vadd.xlane.f32.xlu1 %v257_v3  ;;  %v260_v10 = vadd.f32 %v900_v6, %v898_v5  ;;  %v573_v44 = vld [vmem:[%s998_s2] ss:$0 sm:$0xff]  ;;  %s242_s10 = scalar_lea.vmem [#allocation5], %s571_s25  ;;  %s581_s13 = sshll.u32 %s795_s22, 10 }
  0x3c   : > { %252 = vadd.xlane.f32.xlu0 %v251_v7  ;;  %v254_v11 = vadd.f32 %v906_v9, %v904_v8  ;;  %v271_v14 = vsub.s32 0, %v912_v13  ;;  %v290_v17 = vsub.s32 1, %v912_v13  ;;  %v361_v49 = vadd.s32 4294967288, %v356_v46  ;;  %s491_s11 = sshll.u32 %s242_s10, 4  ;;  %s950_s26 = scalar_lea.hbm %s1001_s5, %s581_s13  ;;  %s945_s11 = int_to_ptr.vmem [resolvable:$true] %s491_s11 }
  0x3d   : > { %v368_v50 = vadd.s32 4294967280, %v356_v46  ;;  %v375_v51 = vadd.s32 4294967272, %v356_v46  ;;  %v359_v55 = vsub.s32 %v356_v46, %v912_v13  ;;  %s478_s22 = scalar_lea.sflag [#allocation4], %s878_s23  ;;  %s669_s28 = scalar_lea.vmem %s945_s11, 1024 }
  0x3e   : > { %v272_v16 = vrot.slane %v267_v15, %v271_v14  ;;  %v291_v18 = vrot.slane %v267_v15, %v290_v17  ;;  %v364_v54 = vsub.s32 %v361_v49, %v912_v13  ;;  %p670_p6 = scmp.ne.s32.totalorder %s945_s11, %s669_s28  ;;  %p1008_p11 = scmp.ne.s32.totalorder %s1005_s30, 0 }
  0x3f   : > { %261 = vadd.xlane.f32.xlu1 %v260_v10  ;;  %v371_v56 = vsub.s32 %v368_v50, %v912_v13  ;;  %v378_v57 = vsub.s32 %v375_v51, %v912_v13  ;;  %s741_s29 = smov [#allocation5]  }
  0x40   : > { %255 = vadd.xlane.f32.xlu0 %v254_v11  ;;  %p671_p12 = pnand %p670_p6, %p1008_p11  ;;  %s673_s12 = sshll.u32 %s741_s29, 4  ;;  %s674_s12 = int_to_ptr.vmem [resolvable:$false] %s673_s12 }
  0x41   : > { %s675_s14 = scalar_lea.vmem %s674_s12, 2048  ;;  %p676_p8 = scmp.lt.s32.totalorder %s945_s11, %s674_s12 }
  0x42   : > { %p672_p13 = pneg %p671_p12  ;;  %p677_p10 = scmp.lt.s32.totalorder %s675_s14, %s669_s28 }
  0x44   : > { %p678_p0 = por %p677_p10, %p676_p8 }
  0x46   : > { %p679_p2 = pnand %p678_p0, %p672_p13 }
  0x50   : > { %278 = vbcast.lane.b32.xlu1 %v272_v16, 264 }
  0x54   : > { %293 = vbcast.lane.b32.xlu1 %v291_v18, 256 }
  0x56   : > { %274 = vbcast.lane.b32.xlu0 %v272_v16, 256 }
  0x58   : > { %297 = vbcast.lane.b32.xlu1 %v291_v18, 264 }
  0x5a   : > { %282 = vbcast.lane.b32.xlu0 %v272_v16, 272 }
  0x5c   : > { %301 = vbcast.lane.b32.xlu1 %v291_v18, 272 }
  0x5e   : > { %286 = vbcast.lane.b32.xlu0 %v272_v16, 280 }
  0x60   : > { %305 = vbcast.lane.b32.xlu1 %v291_v18, 280 }
  0xc8   : > { %v259_v20 = vpop.xlane.xlu1 %258 }
  0xc9   : > { %v253_v21 = vpop.xlane.xlu0 %252  ;;  %v265_v33 = vmul.f32 0.00390625, %v259_v20 }
  0xca   : > { %v263_v25 = vmul.f32 0.00390625, %v253_v21 }
  0xcc   : > { %v262_v22 = vpop.xlane.xlu1 %261 }
  0xcd   : > { %v256_v23 = vpop.xlane.xlu0 %255  ;;  %v266_v38 = vmul.f32 0.00390625, %v262_v22 }
  0xce   : > { %v264_v24 = vmul.f32 0.00390625, %v256_v23 }
  0xd0   : > { %v279_v26 = vpop.permute.xlu1 %278 }
  0xd1   : > { %v316_v27 = vmul.f32 %v279_v26, %v264_v24  ;;  %v275_v28 = vpop.permute.xlu0 %274 }
  0xd2   : > { %v315_v29 = vmul.f32 %v275_v28, %v263_v25 }
  0xd3   : > { %335 = vperm.xlu1 %634, %v316_v27   ;;  %v420_v27 = vld [vmem:[%s999_s3] sm:$0x3] }
  0xd4   : > { %332 = vperm.xlu0 %633, %v315_v29   ;;  %v294_v30 = vpop.permute.xlu1 %293 }
  0xd5   : > { %v319_v31 = vmul.f32 %v294_v30, %v263_v25  ;;  %v283_v32 = vpop.permute.xlu0 %282 }
  0xd6   : > { %v317_v35 = vmul.f32 %v283_v32, %v265_v33 }
  0xd7   : > { %344 = vperm.xlu1 %634, %v319_v31  }
  0xd8   : > { %v298_v34 = vpop.permute.xlu1 %297 }
  0xd9   : > { %v320_v36 = vmul.f32 %v298_v34, %v264_v24  ;;  %v287_v37 = vpop.permute.xlu0 %286 }
  0xda   : > { %v318_v40 = vmul.f32 %v287_v37, %v266_v38 }
  0xdb   : > { %347 = vperm.xlu0 %633, %v320_v36   ;;  %338 = vperm.xlu1 %634, %v317_v35   ;;  %v434_v36 = vld [vmem:[%s1000_s4] sm:$0x1] }
  0xdc   : > { %v302_v39 = vpop.permute.xlu1 %301 }
  0xdd   : > { %v321_v41 = vmul.f32 %v302_v39, %v265_v33 }
  0xdf   : > { %350 = vperm.xlu0 %633, %v321_v41   ;;  %341 = vperm.xlu1 %634, %v318_v40  }
  0xe0   : > { %v306_v42 = vpop.permute.xlu1 %305 }
  0xe1   : > { %v322_v43 = vmul.f32 %v306_v42, %v266_v38 }
  0xe3   : > { %353 = vperm.xlu0 %633, %v322_v43  }
  0xe7   : > { %415 = vbcast.lane.b32.xlu0 %v573_v44, 256 }
 0x152   : > { %v336_v45 = vpop.permute.xlu1 %335 }
 0x153   : > { %v333_v47 = vpop.permute.xlu0 %332  ;;  %v365_v60 = vrot.slane %v336_v45, %v364_v54 }
 0x154   : > { %v360_v61 = vrot.slane %v333_v47, %v359_v55 }
 0x156   : > { %v345_v48 = vpop.permute.xlu1 %344  ;;  %v367_v12 = vsel %vm366_vm0, %v365_v60, %v360_v61 }
 0x157   : > { %v385_v7 = vrot.slane %v345_v48, %v359_v55 }
 0x15a   : > { %v339_v52 = vpop.permute.xlu1 %338  ;;  %v348_v53 = vpop.permute.xlu0 %347 }
 0x15b   : > { %v389_v62 = vrot.slane %v348_v53, %v364_v54  ;;  %v372_v63 = vrot.slane %v339_v52, %v371_v56 }
 0x15d   : > { %v390_v15 = vsel %vm366_vm0, %v389_v62, %v385_v7  ;;  %v374_v17 = vsel %vm373_vm1, %v372_v63, %v367_v12 }
 0x15e   : > { %v342_v58 = vpop.permute.xlu1 %341  ;;  %v351_v59 = vpop.permute.xlu0 %350 }
 0x15f   : > { %v394_v3 = vrot.slane %v351_v59, %v371_v56  ;;  %v379_v10 = vrot.slane %v342_v58, %v378_v57 }
 0x161   : > { %v395_v18 = vsel %vm373_vm1, %v394_v3, %v390_v15  ;;  %v381_v19 = vsel %vm380_vm2, %v379_v10, %v374_v17 }
 0x162   : > { %v354_v11 = vpop.permute.xlu0 %353 }
 0x163   : > { %v399_v16 = vrot.slane %v354_v11, %v378_v57 }
 0x165   : > { %v400_v20 = vsel %vm380_vm2, %v399_v16, %v395_v18 }
 0x166   : > { %v402_v21 = vsel %vm401_vm3, %v400_v20, %v381_v19  ;;  %v416_v23 = vpop.permute.xlu0 %415 }
 0x167   : > { %v405_v22 = vsel %vm404_vm4, %v402_v21, 0.0 }
 0x168   : > { %406 = vadd.xlane.f32.xlu1 %v405_v22 }
 0x1f5   : > { %v407_v24 = vpop.xlane.xlu1 %406 }
 0x1f6   : > { %v418_v25 = vadd.f32 %v416_v23, %v407_v24 }
 0x1f8   : > { %v419_v26 = vmax.f32 %v418_v25, 0.0 }
 0x1fa   : > { %423 = vperm.xlu0 %633, %v419_v26  }
 0x279   : > { %v424_v28 = vpop.permute.xlu0 %423 }
 0x27a   : > { %v426_v29 = vmul.f32 %v424_v28, %v420_v27 }
 0x27c   : > { %v427_v30 = vsel %vm404_vm4, %v426_v29, 0.0 }
 0x27d   : > { %v428_v31 = vrot.slane %v427_v30, 4 }
 0x27f   : > { %v429_v32 = vadd.f32 %v428_v31, %v427_v30 }
 0x281   : > { %v430_v33 = vrot.slane %v429_v32, 2 }
 0x283   : > { %v431_v34 = vadd.f32 %v430_v33, %v429_v32 }
 0x285   : > { %v432_v35 = vrot.slane %v431_v34, 1 }
 0x287   : > { %v433_v37 = vadd.f32 %v432_v35, %v431_v34 }
 0x289   : > { %v435_v38 = vadd.f32 %v434_v36, %v433_v37 }
 0x28b   : > { %v574_v39 = vmul.f32 -1.442695, %v435_v38 }
 0x28d   : > { %635 = vpow2.f32 %v574_v39 }
 0x297   : > { %v636_v40 = vpop.eup %635 }
 0x298   : > { %v439_v41 = vadd.f32 1.0, %v636_v40 }
 0x29a   : > { %637 = vrcp.f32 %v439_v41 }
 0x2a4   : > { %v638_v42 = vpop.eup %637 }
 0x2a5   : > { %v445_v43 = vrot.slane %v638_v42, %v271_v14 }
 0x2a7   : > { %447 = vbcast.lane.b32.xlu0 %v445_v43, 256 }
 0x2ab   : > { %451 = vbcast.lane.b32.xlu0 %v445_v43, 264 }
 0x2af   : > { %455 = vbcast.lane.b32.xlu0 %v445_v43, 272 }
 0x2b3   : > { %459 = vbcast.lane.b32.xlu0 %v445_v43, 280 }
 0x319   : > { %v448_v44 = vpop.permute.xlu0 %447 }
 0x31a   : > { %v461_v45 = vmul.f32 %v448_v44, %v892_v2  ;;  %v462_v46 = vmul.f32 %v448_v44, %v896_v4 }
 0x31c   : > { %469 = vst [vmem:[%s242_s10] sm:$0xff] %v461_v45  ;;  %470 = vst [vmem:[%s242_s10 + $0x8] sm:$0xff] %v462_v46 }
 0x31d   : > { %v452_v47 = vpop.permute.xlu0 %451 }
 0x31e   : > { %v463_v48 = vmul.f32 %v452_v47, %v904_v8  ;;  %v464_v13 = vmul.f32 %v452_v47, %v906_v9 }
 0x320   : > { %471 = vst [vmem:[%s242_s10 + $0x10] sm:$0xff] %v463_v48  ;;  %472 = vst [vmem:[%s242_s10 + $0x18] sm:$0xff] %v464_v13 }
 0x321   : > { %v456_v14 = vpop.permute.xlu0 %455 }
 0x322   : > { %v465_v49 = vmul.f32 %v456_v14, %v888_v0  ;;  %v466_v2 = vmul.f32 %v456_v14, %v890_v1 }
 0x324   : > { %473 = vst [vmem:[%s242_s10 + $0x20] sm:$0xff] %v465_v49  ;;  %474 = vst [vmem:[%s242_s10 + $0x28] sm:$0xff] %v466_v2 }
 0x325   : > { %v460_v4 = vpop.permute.xlu0 %459 }
 0x326   : > { %v467_v8 = vmul.f32 %v460_v4, %v898_v5  ;;  %v468_v0 = vmul.f32 %v460_v4, %v900_v6 }
 0x328   : > { %475 = vst [vmem:[%s242_s10 + $0x30] sm:$0xff] %v467_v8  ;;  %476 = vst [vmem:[%s242_s10 + $0x38] sm:$0xff] %v468_v0 }
 0x329   : > { %682 = shalt.err (!%p679_p2)
}
 0x32a   : > { %s683_s15 = scalar_lea.hbm %s950_s26, 1024  ;;  %s687_s7 = scalar_lea.hbm %s1001_s5, 2048 }
 0x32b   : > { %p684_p4 = scmp.ne.s32.totalorder %s950_s26, %s683_s15  ;;  %p688_p9 = scmp.lt.u32.totalorder %s950_s26, %s1001_s5 }
 0x32c   : > { %p689_p1 = scmp.lt.u32.totalorder %s687_s7, %s683_s15  ;;  %p691_p6 = scmp.lt.u32.totalorder %s683_s15, %s950_s26 }
 0x32d   : > { %p685_p5 = pnand %p684_p4, %p1008_p11 }
 0x32e   : > { %p690_p3 = por %p689_p1, %p688_p9 }
 0x32f   : > { %p686_p7 = pneg %p685_p5 }
 0x330   : > { %p692_p12 = por %p691_p6, %p690_p3 }
 0x332   : > { %p693_p13 = pnand %p692_p12, %p686_p7 }
 0x334   : > { %696 = shalt.err (!%p693_p13)
}
 0x335   : > { %s742_s13 = smov 256   ;;  %s743_s17 = smov 16  }
 0x336   : > { %584 = dma.vmem_to_hbm [thread:$0]  (%p1008_p11), %s945_s11, 1024, %s950_s26, %s478_s22, %s742_s13, %s742_s13, %s743_s17  }
 0x337 PF: > { %s506_s25 = sand.u32 1, %s723_s18   ;;  %p1009_p8 = scmp.ne.s32.totalorder %s1006_s6, 0 }
 0x338   : > { %p1010_p10 = scmp.ge.s32.totalorder %s735_s21, 2  ;;  %s507_s28 = scalar_lea.sflag [#allocation4], %s506_s25 }
 0x33a   : > { %p591_p0 = pnand %p1010_p10, %p1009_p8 }
 0x33c   : > { %718 = dma.done.wait (!%p591_p0), %s507_s28, 1024  }
 0x33d   : > { %720 = vsyncadd (!%p591_p0), %s507_s28, 4294966272  ;;  %p18_p2 = scmp.ge.s32.totalorder %s799_s24, 4   ;;  %s1011_s18 = smov %s727_s19 }
 0x33e   : > { %s1012_s19 = smov %s731_s20  ;;  %s1013_s20 = smov %s811_s27 }
 0x33f   : > { %s1014_s21 = smov %s799_s24  ;;  %20 = sbr.rel (!%p18_p2) target bundleno = 5 (0x5), region = 85 }
 0x346   :  { %512 = vsyncpa [#allocation3], 1 }
 0x347   :  { %514 = vsyncpa [#allocation3 + $0x1], 1 }
 0x348   :  { %515 = vsyncpa [#allocation4], 1 }
 0x349   :  { %517 = vsyncpa [#allocation4 + $0x1], 1 }

</bundles_post_ra>
